<compile_context>
chip_gen: v7x
topology: tpu7x:2x2x1
jax: 0.10.0
libtpu: 0.0.40
codegen_flags: <defaults>
</compile_context>

<pallas_src>
import math
from functools import partial

import jax
import jax.numpy as jnp
from jax.experimental import pallas as pl
from jax.experimental.pallas import tpu as pltpu


def mha_kernel(q_ref, k_ref, v_ref,
               wq_ref, bq_ref, wk_ref, bk_ref, wv_ref, bv_ref,
               wo_ref, bo_ref,
               o_ref,
               *, seq_len, n_head, d_k, scale):
    Rb, E = q_ref.shape            # Rb = Bb * S rows in this batch block
    Bb = Rb // seq_len

    # ---- Q/K/V projections over the full (Bb*S, E) row slab --------------
    # Operands stay in their native dtype (no upcast); MXU accumulates in
    # f32 via preferred_element_type.
    q = jnp.dot(q_ref[...], wq_ref[...], preferred_element_type=jnp.float32) + bq_ref[...]
    k = jnp.dot(k_ref[...], wk_ref[...], preferred_element_type=jnp.float32) + bk_ref[...]
    v = jnp.dot(v_ref[...], wv_ref[...], preferred_element_type=jnp.float32) + bv_ref[...]

    # Fold the 1/sqrt(d_k) score scaling into Q once ((Rb, H) elements)
    # rather than scaling each per-head (Bb, S, S) score matrix.
    q = q * scale

    wo = wo_ref[...]               # hoisted: loaded once, reused per head

    # ---- per-head attention, batched over the Bb batch elements ----------
    out_acc = None
    for h in range(n_head):        # static, small n_head -> fully unrolled
        lo = h * d_k
        qh = q[:, lo:lo + d_k].reshape(Bb, seq_len, d_k)
        kh = k[:, lo:lo + d_k].reshape(Bb, seq_len, d_k)
        vh = v[:, lo:lo + d_k].reshape(Bb, seq_len, d_k)

        # contract last axes directly (no explicit kh.T)
        scores = jnp.einsum('bqd,bkd->bqk', qh, kh,
                            preferred_element_type=jnp.float32)

        # numerically stable softmax; normalization deferred until after P@V
        m = jnp.max(scores, axis=-1, keepdims=True)
        p = jnp.exp(scores - m)
        denom = jnp.sum(p, axis=-1, keepdims=True)       # (Bb, S, 1)

        o_h = jnp.einsum('bqk,bkd->bqd', p, vh,
                         preferred_element_type=jnp.float32)
        o_h = o_h * (1.0 / denom)                        # scale (Bb,S,d_k), not (Bb,S,S)
        # torch.nan_to_num(..., nan=0.0) only matters for fully-masked rows;
        # with no mask there are no NaNs, so it is a no-op here.

        # Fuse the head-concat into accumulated output-projection partials.
        partial_h = jnp.dot(o_h.reshape(Rb, d_k), wo[lo:lo + d_k, :],
                            preferred_element_type=jnp.float32)
        out_acc = partial_h if out_acc is None else out_acc + partial_h

    o_ref[...] = (out_acc + bo_ref[...]).astype(o_ref.dtype)


def _pick_batch_block(B, S, target_rows=512):
    """Largest divisor of B such that Bb*S stays within ~target_rows rows."""
    bb = 1
    for cand in range(1, B + 1):
        if B % cand == 0 and cand * S <= max(target_rows, S):
            bb = cand
    return bb


def multi_head_attention(q_, k_, v_, params, *, n_head, hidden_dimension,
                         batch_block=None):
    B, S, E = q_.shape
    H = params["wq"].shape[1]            # n_head * d_k
    Hout = params["wo"].shape[1]         # hidden_dimension
    d_k = H // n_head
    # ScaledDotProductAttention scales by 1/sqrt(hidden_dimension / n_head)
    scale = 1.0 / math.sqrt(hidden_dimension / n_head)

    Bb = batch_block if batch_block is not None else _pick_batch_block(B, S)
    assert B % Bb == 0, "batch_block must divide batch size"
    Rb = Bb * S
    assert (Rb % 8 == 0) or (Bb == B), "row block must be sublane-aligned or full"

    # Present the activations as flat 2-D row slabs (free reshapes: HBM layout
    # is identical); the kernel then works on plain 2-D tiles with no in-kernel
    # batch/seq merging and simple contiguous DMA per grid step.
    q2 = q_.reshape(B * S, E)
    k2 = k_.reshape(B * S, E)
    v2 = v_.reshape(B * S, E)

    kernel = partial(mha_kernel, seq_len=S, n_head=n_head, d_k=d_k, scale=scale)

    act_spec = pl.BlockSpec((Rb, E), lambda b: (b, 0))

    def w_spec(shape):
        # constant index map -> weight block stays resident, DMA'd once
        return pl.BlockSpec(shape, lambda b: (0, 0))

    out2 = pl.pallas_call(
        kernel,
        out_shape=jax.ShapeDtypeStruct((B * S, Hout), q_.dtype),
        grid=(B // Bb,),
        in_specs=[
            act_spec, act_spec, act_spec,
            w_spec((E, H)), w_spec((1, H)),
            w_spec((E, H)), w_spec((1, H)),
            w_spec((E, H)), w_spec((1, H)),
            w_spec((H, Hout)), w_spec((1, Hout)),
        ],
        out_specs=pl.BlockSpec((Rb, Hout), lambda b: (b, 0)),
        compiler_params=pltpu.CompilerParams(
            dimension_semantics=("parallel",)),
    )(q2, k2, v2,
      params["wq"], params["bq"],
      params["wk"], params["bk"],
      params["wv"], params["bv"],
      params["wo"], params["bo"])

    return out2.reshape(B, S, Hout)


def xavier_uniform(key, fan_in, fan_out, dtype=jnp.float32):
    bound = math.sqrt(6.0 / (fan_in + fan_out))
    return jax.random.uniform(key, (fan_in, fan_out), dtype,
                              minval=-bound, maxval=bound)


def init_params(key, embedding_dim, hidden_dimension, n_head):
    d_k = hidden_dimension // n_head
    H = d_k * n_head
    ks = jax.random.split(key, 4)
    return {
        "wq": xavier_uniform(ks[0], embedding_dim, H),
        "bq": jnp.zeros((1, H), jnp.float32),
        "wk": xavier_uniform(ks[1], embedding_dim, H),
        "bk": jnp.zeros((1, H), jnp.float32),
        "wv": xavier_uniform(ks[2], embedding_dim, H),
        "bv": jnp.zeros((1, H), jnp.float32),
        "wo": xavier_uniform(ks[3], H, hidden_dimension),
        "bo": jnp.zeros((1, hidden_dimension), jnp.float32),
    }


def reference_mha(q_, k_, v_, params, *, n_head, hidden_dimension):
    # Pure-JAX reference of the PyTorch forward (mask=None, dropout=eval).
    B, S, E = q_.shape
    H = params["wq"].shape[1]
    d_k = H // n_head
    root_dk = math.sqrt(hidden_dimension / n_head)

    def proj(x, w, b):
        return x @ w + b[0]

    q = proj(q_, params["wq"], params["bq"]).reshape(B, S, n_head, d_k).transpose(0, 2, 1, 3)
    k = proj(k_, params["wk"], params["bk"]).reshape(B, S, n_head, d_k).transpose(0, 2, 1, 3)
    v = proj(v_, params["wv"], params["bv"]).reshape(B, S, n_head, d_k).transpose(0, 2, 1, 3)

    scores = jnp.einsum("bhqd,bhkd->bhqk", q, k) / root_dk
    attn = jax.nn.softmax(scores, axis=-1)
    out = jnp.einsum("bhqk,bhkd->bhqd", attn, v)
    concat = out.transpose(0, 2, 1, 3).reshape(B, S, H)
    return concat @ params["wo"] + params["bo"][0]


if __name__ == "__main__":
    # Small shapes consistent with the module
    B, S = 2, 8
    embedding_dim = 32
    hidden_dimension = 32
    n_head = 4
    dropout_rate = 0.1  # eval-mode identity

    key = jax.random.PRNGKey(0)
    kp, kq, kk, kv = jax.random.split(key, 4)
    params = init_params(kp, embedding_dim, hidden_dimension, n_head)

    q_ = jax.random.normal(kq, (B, S, embedding_dim), jnp.float32)
    k_ = jax.random.normal(kk, (B, S, embedding_dim), jnp.float32)
    v_ = jax.random.normal(kv, (B, S, embedding_dim), jnp.float32)

    out = multi_head_attention(q_, k_, v_, params,
                               n_head=n_head,
                               hidden_dimension=hidden_dimension)
    out = jax.block_until_ready(out)

    ref = reference_mha(q_, k_, v_, params,
                        n_head=n_head,
                        hidden_dimension=hidden_dimension)
    assert out.shape == (B, S, hidden_dimension)
    assert jnp.allclose(out, ref, atol=1e-5, rtol=1e-5)

    print("KERNEL_OK")
</pallas_src>

<mosaic_0001>
module attributes {stable_mosaic.version = 11 : i64} {
  func.func @mha_kernel(%arg0: i32, %arg1: memref<16x32xf32, #tpu.memory_space<vmem>>, %arg2: memref<16x32xf32, #tpu.memory_space<vmem>>, %arg3: memref<16x32xf32, #tpu.memory_space<vmem>>, %arg4: memref<32x32xf32, #tpu.memory_space<vmem>>, %arg5: memref<1x32xf32, #tpu.memory_space<vmem>>, %arg6: memref<32x32xf32, #tpu.memory_space<vmem>>, %arg7: memref<1x32xf32, #tpu.memory_space<vmem>>, %arg8: memref<32x32xf32, #tpu.memory_space<vmem>>, %arg9: memref<1x32xf32, #tpu.memory_space<vmem>>, %arg10: memref<32x32xf32, #tpu.memory_space<vmem>>, %arg11: memref<1x32xf32, #tpu.memory_space<vmem>>, %arg12: memref<16x32xf32, #tpu.memory_space<vmem>>) attributes {dimension_semantics = [#tpu.dimension_semantics<parallel>], iteration_bounds = array<i64: 1>, scalar_prefetch = 0 : i64, scratch_operands = 0 : i64, tpu.core_type = #tpu.core_type<tc>, window_params = [{transform_indices = @transform_0, window_bounds = array<i64: 16, 32>}, {transform_indices = @transform_1, window_bounds = array<i64: 16, 32>}, {transform_indices = @transform_2, window_bounds = array<i64: 16, 32>}, {pipeline_mode = #tpu.pipeline_mode<synchronous>, transform_indices = @transform_3, window_bounds = array<i64: 32, 32>}, {pipeline_mode = #tpu.pipeline_mode<synchronous>, transform_indices = @transform_4, window_bounds = array<i64: 1, 32>}, {pipeline_mode = #tpu.pipeline_mode<synchronous>, transform_indices = @transform_5, window_bounds = array<i64: 32, 32>}, {pipeline_mode = #tpu.pipeline_mode<synchronous>, transform_indices = @transform_6, window_bounds = array<i64: 1, 32>}, {pipeline_mode = #tpu.pipeline_mode<synchronous>, transform_indices = @transform_7, window_bounds = array<i64: 32, 32>}, {pipeline_mode = #tpu.pipeline_mode<synchronous>, transform_indices = @transform_8, window_bounds = array<i64: 1, 32>}, {pipeline_mode = #tpu.pipeline_mode<synchronous>, transform_indices = @transform_9, window_bounds = array<i64: 32, 32>}, {pipeline_mode = #tpu.pipeline_mode<synchronous>, transform_indices = @transform_10, window_bounds = array<i64: 1, 32>}, {transform_indices = @transform_11, window_bounds = array<i64: 16, 32>}]} {
    %c0 = arith.constant 0 : index
    %c0_0 = arith.constant 0 : index
    %0 = vector.load %arg1[%c0, %c0_0] : memref<16x32xf32, #tpu.memory_space<vmem>>, vector<16x32xf32>
    %c0_1 = arith.constant 0 : index
    %c0_2 = arith.constant 0 : index
    %1 = vector.load %arg4[%c0_1, %c0_2] : memref<32x32xf32, #tpu.memory_space<vmem>>, vector<32x32xf32>
    %cst = arith.constant dense<0.000000e+00> : vector<16x32xf32>
    %2 = tpu.matmul %0, %1, %cst {dimension_numbers = #tpu.dot_dimension_numbers<[1], [0], [0], [1], [0, 0, 1, 1], [], []>} : vector<16x32xf32>, vector<32x32xf32>, vector<16x32xf32> -> vector<16x32xf32>
    %c0_3 = arith.constant 0 : index
    %c0_4 = arith.constant 0 : index
    %3 = vector.load %arg5[%c0_3, %c0_4] : memref<1x32xf32, #tpu.memory_space<vmem>>, vector<1x32xf32>
    %4 = vector.broadcast %3 : vector<1x32xf32> to vector<16x32xf32>
    %5 = arith.addf %2, %4 : vector<16x32xf32>
    %c0_5 = arith.constant 0 : index
    %c0_6 = arith.constant 0 : index
    %6 = vector.load %arg2[%c0_5, %c0_6] : memref<16x32xf32, #tpu.memory_space<vmem>>, vector<16x32xf32>
    %c0_7 = arith.constant 0 : index
    %c0_8 = arith.constant 0 : index
    %7 = vector.load %arg6[%c0_7, %c0_8] : memref<32x32xf32, #tpu.memory_space<vmem>>, vector<32x32xf32>
    %cst_9 = arith.constant dense<0.000000e+00> : vector<16x32xf32>
    %8 = tpu.matmul %6, %7, %cst_9 {dimension_numbers = #tpu.dot_dimension_numbers<[1], [0], [0], [1], [0, 0, 1, 1], [], []>} : vector<16x32xf32>, vector<32x32xf32>, vector<16x32xf32> -> vector<16x32xf32>
    %c0_10 = arith.constant 0 : index
    %c0_11 = arith.constant 0 : index
    %9 = vector.load %arg7[%c0_10, %c0_11] : memref<1x32xf32, #tpu.memory_space<vmem>>, vector<1x32xf32>
    %10 = vector.broadcast %9 : vector<1x32xf32> to vector<16x32xf32>
    %11 = arith.addf %8, %10 : vector<16x32xf32>
    %c0_12 = arith.constant 0 : index
    %c0_13 = arith.constant 0 : index
    %12 = vector.load %arg3[%c0_12, %c0_13] : memref<16x32xf32, #tpu.memory_space<vmem>>, vector<16x32xf32>
    %c0_14 = arith.constant 0 : index
    %c0_15 = arith.constant 0 : index
    %13 = vector.load %arg8[%c0_14, %c0_15] : memref<32x32xf32, #tpu.memory_space<vmem>>, vector<32x32xf32>
    %cst_16 = arith.constant dense<0.000000e+00> : vector<16x32xf32>
    %14 = tpu.matmul %12, %13, %cst_16 {dimension_numbers = #tpu.dot_dimension_numbers<[1], [0], [0], [1], [0, 0, 1, 1], [], []>} : vector<16x32xf32>, vector<32x32xf32>, vector<16x32xf32> -> vector<16x32xf32>
    %c0_17 = arith.constant 0 : index
    %c0_18 = arith.constant 0 : index
    %15 = vector.load %arg9[%c0_17, %c0_18] : memref<1x32xf32, #tpu.memory_space<vmem>>, vector<1x32xf32>
    %16 = vector.broadcast %15 : vector<1x32xf32> to vector<16x32xf32>
    %17 = arith.addf %14, %16 : vector<16x32xf32>
    %cst_19 = arith.constant 0.353553385 : f32
    %18 = vector.broadcast %cst_19 : f32 to vector<16x32xf32>
    %19 = arith.mulf %5, %18 : vector<16x32xf32>
    %c0_20 = arith.constant 0 : index
    %c0_21 = arith.constant 0 : index
    %20 = vector.load %arg10[%c0_20, %c0_21] : memref<32x32xf32, #tpu.memory_space<vmem>>, vector<32x32xf32>
    %21 = vector.extract_strided_slice %19 {offsets = [0, 0], sizes = [16, 8], strides = [1, 1]} : vector<16x32xf32> to vector<16x8xf32>
    %22 = vector.shape_cast %21 : vector<16x8xf32> to vector<2x8x8xf32>
    %23 = vector.extract_strided_slice %11 {offsets = [0, 0], sizes = [16, 8], strides = [1, 1]} : vector<16x32xf32> to vector<16x8xf32>
    %24 = vector.shape_cast %23 : vector<16x8xf32> to vector<2x8x8xf32>
    %25 = vector.extract_strided_slice %17 {offsets = [0, 0], sizes = [16, 8], strides = [1, 1]} : vector<16x32xf32> to vector<16x8xf32>
    %26 = vector.shape_cast %25 : vector<16x8xf32> to vector<2x8x8xf32>
    "tpu.trace_start"() <{level = 10 : i32, message = "bqd,bkd->bqk"}> : () -> ()
    %cst_22 = arith.constant dense<0.000000e+00> : vector<2x8x8xf32>
    %27 = tpu.matmul %22, %24, %cst_22 {dimension_numbers = #tpu.dot_dimension_numbers<[2], [2], [1], [1], [0, 0, 0, 1, 1, 1], [0], [0]>} : vector<2x8x8xf32>, vector<2x8x8xf32>, vector<2x8x8xf32> -> vector<2x8x8xf32>
    "tpu.trace_stop"() : () -> ()
    %cst_23 = arith.constant dense<0xFF800000> : vector<2x8xf32>
    %28 = vector.multi_reduction <maximumf>, %27, %cst_23 [2] : vector<2x8x8xf32> to vector<2x8xf32>
    %29 = vector.shape_cast %28 : vector<2x8xf32> to vector<2x8x1xf32>
    %30 = vector.broadcast %29 : vector<2x8x1xf32> to vector<2x8x8xf32>
    %31 = arith.subf %27, %30 : vector<2x8x8xf32>
    %32 = math.exp %31 : vector<2x8x8xf32>
    %cst_24 = arith.constant dense<0.000000e+00> : vector<2x8xf32>
    %33 = vector.multi_reduction <add>, %32, %cst_24 [2] : vector<2x8x8xf32> to vector<2x8xf32>
    %34 = vector.shape_cast %33 : vector<2x8xf32> to vector<2x8x1xf32>
    "tpu.trace_start"() <{level = 10 : i32, message = "bqk,bkd->bqd"}> : () -> ()
    %cst_25 = arith.constant dense<0.000000e+00> : vector<2x8x8xf32>
    %35 = tpu.matmul %32, %26, %cst_25 {dimension_numbers = #tpu.dot_dimension_numbers<[2], [1], [1], [2], [0, 0, 0, 1, 1, 2], [0], [0]>} : vector<2x8x8xf32>, vector<2x8x8xf32>, vector<2x8x8xf32> -> vector<2x8x8xf32>
    "tpu.trace_stop"() : () -> ()
    %cst_26 = arith.constant 1.000000e+00 : f32
    %36 = vector.broadcast %cst_26 : f32 to vector<2x8x1xf32>
    %37 = arith.divf %36, %34 : vector<2x8x1xf32>
    %38 = vector.broadcast %37 : vector<2x8x1xf32> to vector<2x8x8xf32>
    %39 = arith.mulf %35, %38 : vector<2x8x8xf32>
    %40 = vector.shape_cast %39 : vector<2x8x8xf32> to vector<16x8xf32>
    %41 = vector.extract_strided_slice %20 {offsets = [0, 0], sizes = [8, 32], strides = [1, 1]} : vector<32x32xf32> to vector<8x32xf32>
    %cst_27 = arith.constant dense<0.000000e+00> : vector<16x32xf32>
    %42 = tpu.matmul %40, %41, %cst_27 {dimension_numbers = #tpu.dot_dimension_numbers<[1], [0], [0], [1], [0, 0, 1, 1], [], []>} : vector<16x8xf32>, vector<8x32xf32>, vector<16x32xf32> -> vector<16x32xf32>
    %43 = vector.extract_strided_slice %19 {offsets = [0, 8], sizes = [16, 8], strides = [1, 1]} : vector<16x32xf32> to vector<16x8xf32>
    %44 = vector.shape_cast %43 : vector<16x8xf32> to vector<2x8x8xf32>
    %45 = vector.extract_strided_slice %11 {offsets = [0, 8], sizes = [16, 8], strides = [1, 1]} : vector<16x32xf32> to vector<16x8xf32>
    %46 = vector.shape_cast %45 : vector<16x8xf32> to vector<2x8x8xf32>
    %47 = vector.extract_strided_slice %17 {offsets = [0, 8], sizes = [16, 8], strides = [1, 1]} : vector<16x32xf32> to vector<16x8xf32>
    %48 = vector.shape_cast %47 : vector<16x8xf32> to vector<2x8x8xf32>
    "tpu.trace_start"() <{level = 10 : i32, message = "bqd,bkd->bqk"}> : () -> ()
    %cst_28 = arith.constant dense<0.000000e+00> : vector<2x8x8xf32>
    %49 = tpu.matmul %44, %46, %cst_28 {dimension_numbers = #tpu.dot_dimension_numbers<[2], [2], [1], [1], [0, 0, 0, 1, 1, 1], [0], [0]>} : vector<2x8x8xf32>, vector<2x8x8xf32>, vector<2x8x8xf32> -> vector<2x8x8xf32>
    "tpu.trace_stop"() : () -> ()
    %cst_29 = arith.constant dense<0xFF800000> : vector<2x8xf32>
    %50 = vector.multi_reduction <maximumf>, %49, %cst_29 [2] : vector<2x8x8xf32> to vector<2x8xf32>
    %51 = vector.shape_cast %50 : vector<2x8xf32> to vector<2x8x1xf32>
    %52 = vector.broadcast %51 : vector<2x8x1xf32> to vector<2x8x8xf32>
    %53 = arith.subf %49, %52 : vector<2x8x8xf32>
    %54 = math.exp %53 : vector<2x8x8xf32>
    %cst_30 = arith.constant dense<0.000000e+00> : vector<2x8xf32>
    %55 = vector.multi_reduction <add>, %54, %cst_30 [2] : vector<2x8x8xf32> to vector<2x8xf32>
    %56 = vector.shape_cast %55 : vector<2x8xf32> to vector<2x8x1xf32>
    "tpu.trace_start"() <{level = 10 : i32, message = "bqk,bkd->bqd"}> : () -> ()
    %cst_31 = arith.constant dense<0.000000e+00> : vector<2x8x8xf32>
    %57 = tpu.matmul %54, %48, %cst_31 {dimension_numbers = #tpu.dot_dimension_numbers<[2], [1], [1], [2], [0, 0, 0, 1, 1, 2], [0], [0]>} : vector<2x8x8xf32>, vector<2x8x8xf32>, vector<2x8x8xf32> -> vector<2x8x8xf32>
    "tpu.trace_stop"() : () -> ()
    %cst_32 = arith.constant 1.000000e+00 : f32
    %58 = vector.broadcast %cst_32 : f32 to vector<2x8x1xf32>
    %59 = arith.divf %58, %56 : vector<2x8x1xf32>
    %60 = vector.broadcast %59 : vector<2x8x1xf32> to vector<2x8x8xf32>
    %61 = arith.mulf %57, %60 : vector<2x8x8xf32>
    %62 = vector.shape_cast %61 : vector<2x8x8xf32> to vector<16x8xf32>
    %63 = vector.extract_strided_slice %20 {offsets = [8, 0], sizes = [8, 32], strides = [1, 1]} : vector<32x32xf32> to vector<8x32xf32>
    %cst_33 = arith.constant dense<0.000000e+00> : vector<16x32xf32>
    %64 = tpu.matmul %62, %63, %cst_33 {dimension_numbers = #tpu.dot_dimension_numbers<[1], [0], [0], [1], [0, 0, 1, 1], [], []>} : vector<16x8xf32>, vector<8x32xf32>, vector<16x32xf32> -> vector<16x32xf32>
    %65 = arith.addf %42, %64 : vector<16x32xf32>
    %66 = vector.extract_strided_slice %19 {offsets = [0, 16], sizes = [16, 8], strides = [1, 1]} : vector<16x32xf32> to vector<16x8xf32>
    %67 = vector.shape_cast %66 : vector<16x8xf32> to vector<2x8x8xf32>
    %68 = vector.extract_strided_slice %11 {offsets = [0, 16], sizes = [16, 8], strides = [1, 1]} : vector<16x32xf32> to vector<16x8xf32>
    %69 = vector.shape_cast %68 : vector<16x8xf32> to vector<2x8x8xf32>
    %70 = vector.extract_strided_slice %17 {offsets = [0, 16], sizes = [16, 8], strides = [1, 1]} : vector<16x32xf32> to vector<16x8xf32>
    %71 = vector.shape_cast %70 : vector<16x8xf32> to vector<2x8x8xf32>
    "tpu.trace_start"() <{level = 10 : i32, message = "bqd,bkd->bqk"}> : () -> ()
    %cst_34 = arith.constant dense<0.000000e+00> : vector<2x8x8xf32>
    %72 = tpu.matmul %67, %69, %cst_34 {dimension_numbers = #tpu.dot_dimension_numbers<[2], [2], [1], [1], [0, 0, 0, 1, 1, 1], [0], [0]>} : vector<2x8x8xf32>, vector<2x8x8xf32>, vector<2x8x8xf32> -> vector<2x8x8xf32>
    "tpu.trace_stop"() : () -> ()
    %cst_35 = arith.constant dense<0xFF800000> : vector<2x8xf32>
    %73 = vector.multi_reduction <maximumf>, %72, %cst_35 [2] : vector<2x8x8xf32> to vector<2x8xf32>
    %74 = vector.shape_cast %73 : vector<2x8xf32> to vector<2x8x1xf32>
    %75 = vector.broadcast %74 : vector<2x8x1xf32> to vector<2x8x8xf32>
    %76 = arith.subf %72, %75 : vector<2x8x8xf32>
    %77 = math.exp %76 : vector<2x8x8xf32>
    %cst_36 = arith.constant dense<0.000000e+00> : vector<2x8xf32>
    %78 = vector.multi_reduction <add>, %77, %cst_36 [2] : vector<2x8x8xf32> to vector<2x8xf32>
    %79 = vector.shape_cast %78 : vector<2x8xf32> to vector<2x8x1xf32>
    "tpu.trace_start"() <{level = 10 : i32, message = "bqk,bkd->bqd"}> : () -> ()
    %cst_37 = arith.constant dense<0.000000e+00> : vector<2x8x8xf32>
    %80 = tpu.matmul %77, %71, %cst_37 {dimension_numbers = #tpu.dot_dimension_numbers<[2], [1], [1], [2], [0, 0, 0, 1, 1, 2], [0], [0]>} : vector<2x8x8xf32>, vector<2x8x8xf32>, vector<2x8x8xf32> -> vector<2x8x8xf32>
    "tpu.trace_stop"() : () -> ()
    %cst_38 = arith.constant 1.000000e+00 : f32
    %81 = vector.broadcast %cst_38 : f32 to vector<2x8x1xf32>
    %82 = arith.divf %81, %79 : vector<2x8x1xf32>
    %83 = vector.broadcast %82 : vector<2x8x1xf32> to vector<2x8x8xf32>
    %84 = arith.mulf %80, %83 : vector<2x8x8xf32>
    %85 = vector.shape_cast %84 : vector<2x8x8xf32> to vector<16x8xf32>
    %86 = vector.extract_strided_slice %20 {offsets = [16, 0], sizes = [8, 32], strides = [1, 1]} : vector<32x32xf32> to vector<8x32xf32>
    %cst_39 = arith.constant dense<0.000000e+00> : vector<16x32xf32>
    %87 = tpu.matmul %85, %86, %cst_39 {dimension_numbers = #tpu.dot_dimension_numbers<[1], [0], [0], [1], [0, 0, 1, 1], [], []>} : vector<16x8xf32>, vector<8x32xf32>, vector<16x32xf32> -> vector<16x32xf32>
    %88 = arith.addf %65, %87 : vector<16x32xf32>
    %89 = vector.extract_strided_slice %19 {offsets = [0, 24], sizes = [16, 8], strides = [1, 1]} : vector<16x32xf32> to vector<16x8xf32>
    %90 = vector.shape_cast %89 : vector<16x8xf32> to vector<2x8x8xf32>
    %91 = vector.extract_strided_slice %11 {offsets = [0, 24], sizes = [16, 8], strides = [1, 1]} : vector<16x32xf32> to vector<16x8xf32>
    %92 = vector.shape_cast %91 : vector<16x8xf32> to vector<2x8x8xf32>
    %93 = vector.extract_strided_slice %17 {offsets = [0, 24], sizes = [16, 8], strides = [1, 1]} : vector<16x32xf32> to vector<16x8xf32>
    %94 = vector.shape_cast %93 : vector<16x8xf32> to vector<2x8x8xf32>
    "tpu.trace_start"() <{level = 10 : i32, message = "bqd,bkd->bqk"}> : () -> ()
    %cst_40 = arith.constant dense<0.000000e+00> : vector<2x8x8xf32>
    %95 = tpu.matmul %90, %92, %cst_40 {dimension_numbers = #tpu.dot_dimension_numbers<[2], [2], [1], [1], [0, 0, 0, 1, 1, 1], [0], [0]>} : vector<2x8x8xf32>, vector<2x8x8xf32>, vector<2x8x8xf32> -> vector<2x8x8xf32>
    "tpu.trace_stop"() : () -> ()
    %cst_41 = arith.constant dense<0xFF800000> : vector<2x8xf32>
    %96 = vector.multi_reduction <maximumf>, %95, %cst_41 [2] : vector<2x8x8xf32> to vector<2x8xf32>
    %97 = vector.shape_cast %96 : vector<2x8xf32> to vector<2x8x1xf32>
    %98 = vector.broadcast %97 : vector<2x8x1xf32> to vector<2x8x8xf32>
    %99 = arith.subf %95, %98 : vector<2x8x8xf32>
    %100 = math.exp %99 : vector<2x8x8xf32>
    %cst_42 = arith.constant dense<0.000000e+00> : vector<2x8xf32>
    %101 = vector.multi_reduction <add>, %100, %cst_42 [2] : vector<2x8x8xf32> to vector<2x8xf32>
    %102 = vector.shape_cast %101 : vector<2x8xf32> to vector<2x8x1xf32>
    "tpu.trace_start"() <{level = 10 : i32, message = "bqk,bkd->bqd"}> : () -> ()
    %cst_43 = arith.constant dense<0.000000e+00> : vector<2x8x8xf32>
    %103 = tpu.matmul %100, %94, %cst_43 {dimension_numbers = #tpu.dot_dimension_numbers<[2], [1], [1], [2], [0, 0, 0, 1, 1, 2], [0], [0]>} : vector<2x8x8xf32>, vector<2x8x8xf32>, vector<2x8x8xf32> -> vector<2x8x8xf32>
    "tpu.trace_stop"() : () -> ()
    %cst_44 = arith.constant 1.000000e+00 : f32
    %104 = vector.broadcast %cst_44 : f32 to vector<2x8x1xf32>
    %105 = arith.divf %104, %102 : vector<2x8x1xf32>
    %106 = vector.broadcast %105 : vector<2x8x1xf32> to vector<2x8x8xf32>
    %107 = arith.mulf %103, %106 : vector<2x8x8xf32>
    %108 = vector.shape_cast %107 : vector<2x8x8xf32> to vector<16x8xf32>
    %109 = vector.extract_strided_slice %20 {offsets = [24, 0], sizes = [8, 32], strides = [1, 1]} : vector<32x32xf32> to vector<8x32xf32>
    %cst_45 = arith.constant dense<0.000000e+00> : vector<16x32xf32>
    %110 = tpu.matmul %108, %109, %cst_45 {dimension_numbers = #tpu.dot_dimension_numbers<[1], [0], [0], [1], [0, 0, 1, 1], [], []>} : vector<16x8xf32>, vector<8x32xf32>, vector<16x32xf32> -> vector<16x32xf32>
    %111 = arith.addf %88, %110 : vector<16x32xf32>
    %c0_46 = arith.constant 0 : index
    %c0_47 = arith.constant 0 : index
    %112 = vector.load %arg11[%c0_46, %c0_47] : memref<1x32xf32, #tpu.memory_space<vmem>>, vector<1x32xf32>
    %113 = vector.broadcast %112 : vector<1x32xf32> to vector<16x32xf32>
    %114 = arith.addf %111, %113 : vector<16x32xf32>
    %c0_48 = arith.constant 0 : index
    %c0_49 = arith.constant 0 : index
    %115 = vector.load %arg12[%c0_48, %c0_49] : memref<16x32xf32, #tpu.memory_space<vmem>>, vector<16x32xf32>
    tpu.vector_store %arg12[%c0_48, %c0_49], %114 {strides = array<i32>} : memref<16x32xf32, #tpu.memory_space<vmem>>, vector<16x32xf32>,
    return
  }
  func.func @transform_0(%arg0: i32) -> (i32, i32) {
    %c0_i32 = arith.constant 0 : i32
    %c0_i32_0 = arith.constant 0 : i32
    return %arg0, %c0_i32 : i32, i32
  }
  func.func @transform_1(%arg0: i32) -> (i32, i32) {
    %c0_i32 = arith.constant 0 : i32
    %c0_i32_0 = arith.constant 0 : i32
    return %arg0, %c0_i32 : i32, i32
  }
  func.func @transform_2(%arg0: i32) -> (i32, i32) {
    %c0_i32 = arith.constant 0 : i32
    %c0_i32_0 = arith.constant 0 : i32
    return %arg0, %c0_i32 : i32, i32
  }
  func.func @transform_3(%arg0: i32) -> (i32, i32) {
    %c0_i32 = arith.constant 0 : i32
    %c0_i32_0 = arith.constant 0 : i32
    %c0_i32_1 = arith.constant 0 : i32
    return %c0_i32, %c0_i32_0 : i32, i32
  }
  func.func @transform_4(%arg0: i32) -> (i32, i32) {
    %c0_i32 = arith.constant 0 : i32
    %c0_i32_0 = arith.constant 0 : i32
    %c0_i32_1 = arith.constant 0 : i32
    return %c0_i32, %c0_i32_0 : i32, i32
  }
  func.func @transform_5(%arg0: i32) -> (i32, i32) {
    %c0_i32 = arith.constant 0 : i32
    %c0_i32_0 = arith.constant 0 : i32
    %c0_i32_1 = arith.constant 0 : i32
    return %c0_i32, %c0_i32_0 : i32, i32
  }
  func.func @transform_6(%arg0: i32) -> (i32, i32) {
    %c0_i32 = arith.constant 0 : i32
    %c0_i32_0 = arith.constant 0 : i32
    %c0_i32_1 = arith.constant 0 : i32
    return %c0_i32, %c0_i32_0 : i32, i32
  }
  func.func @transform_7(%arg0: i32) -> (i32, i32) {
    %c0_i32 = arith.constant 0 : i32
    %c0_i32_0 = arith.constant 0 : i32
    %c0_i32_1 = arith.constant 0 : i32
    return %c0_i32, %c0_i32_0 : i32, i32
  }
  func.func @transform_8(%arg0: i32) -> (i32, i32) {
    %c0_i32 = arith.constant 0 : i32
    %c0_i32_0 = arith.constant 0 : i32
    %c0_i32_1 = arith.constant 0 : i32
    return %c0_i32, %c0_i32_0 : i32, i32
  }
  func.func @transform_9(%arg0: i32) -> (i32, i32) {
    %c0_i32 = arith.constant 0 : i32
    %c0_i32_0 = arith.constant 0 : i32
    %c0_i32_1 = arith.constant 0 : i32
    return %c0_i32, %c0_i32_0 : i32, i32
  }
  func.func @transform_10(%arg0: i32) -> (i32, i32) {
    %c0_i32 = arith.constant 0 : i32
    %c0_i32_0 = arith.constant 0 : i32
    %c0_i32_1 = arith.constant 0 : i32
    return %c0_i32, %c0_i32_0 : i32, i32
  }
  func.func @transform_11(%arg0: i32) -> (i32, i32) {
    %c0_i32 = arith.constant 0 : i32
    %c0_i32_0 = arith.constant 0 : i32
    return %arg0, %c0_i32 : i32, i32
  }
}

</mosaic_0001>

<bundles_post_ra>
// kernel: tpu_custom_call.1
= control target key start
LH: loop header
LB: loop body
LE: loop exit
PB: predicated region body
PF: predicated region fallthrough
CT: control target
= control target key end

     0   :  { %16 = vsyncpa [#allocation3], 0  ;;  %s2999_s0 = inlined_call_operand.hbm [shape: f32[16,32], index: 0, kind: input, shape index: {}]   ;;  %s3000_s1 = inlined_call_operand.hbm [shape: f32[16,32], index: 1, kind: input, shape index: {}]   ;;  %s3001_s2 = inlined_call_operand.hbm [shape: f32[16,32], index: 2, kind: input, shape index: {}]   ;;  %s3002_s3 = inlined_call_operand.hbm [shape: f32[32,32], index: 3, kind: input, shape index: {}]   ;;  %s3003_s4 = inlined_call_operand.vmem [shape: f32[1,32], index: 4, kind: input, shape index: {}]   ;;  %s3004_s5 = inlined_call_operand.hbm [shape: f32[32,32], index: 5, kind: input, shape index: {}]   ;;  %s3005_s6 = inlined_call_operand.vmem [shape: f32[1,32], index: 6, kind: input, shape index: {}]   ;;  %s3006_s7 = inlined_call_operand.hbm [shape: f32[32,32], index: 7, kind: input, shape index: {}]   ;;  %s3007_s8 = inlined_call_operand.hbm [shape: f32[1,32], index: 8, kind: input, shape index: {}]   ;;  %s3008_s9 = inlined_call_operand.vmem [shape: f32[32,32], index: 9, kind: input, shape index: {}]   ;;  %s3009_s10 = inlined_call_operand.vmem [shape: f32[1,32], index: 10, kind: input, shape index: {}]   ;;  %s3010_s11 = inlined_call_operand.hbm [shape: f32[16,32], index: 11, kind: output, shape index: {}]  }
   0x1   :  { %17 = vsyncpa [#allocation6], 0 }
   0x2   :  { %18 = vsyncpa [#allocation9], 0 }
   0x3   :  { %19 = vsyncpa [#allocation12], 0 }
   0x4   :  { %20 = vsyncpa [#allocation4], 0  ;;  %s2601_s17 = smov [#allocation5]   ;;  %s2602_s19 = smov [#allocation8]  }
   0x5   :  { %s38_s18 = sshll.u32 %s2601_s17, 4  ;;  %s62_s20 = sshll.u32 %s2602_s19, 4  ;;  %s39_s18 = int_to_ptr.vmem [resolvable:$true] %s38_s18  ;;  %s2676_s20 = int_to_ptr.vmem [resolvable:$true] %s62_s20 }
   0x6   :  { %s2415_s23 = scalar_lea.hbm %s3000_s1, 256 }
   0x7   :  { %p2416_p0 = scmp.ne.s32.totalorder %s3000_s1, %s2415_s23  ;;  %p2419_p1 = scmp.lt.u32.totalorder %s2415_s23, %s3000_s1 }
   0x9   :  { %p2421_p2 = pnand %p2419_p1, %p2416_p0 }
   0xb   :  { %2424 = shalt.err (!%p2421_p2)
}
   0xc   :  { %s2425_s28 = scalar_lea.vmem %s39_s18, 256  ;;  %p2430_p4 = scmp.lt.s32.totalorder %s39_s18, %s39_s18 }
   0xd   :  { %p2426_p3 = scmp.ne.s32.totalorder %s39_s18, %s2425_s28  ;;  %p2431_p5 = scmp.lt.s32.totalorder %s2425_s28, %s2425_s28 }
   0xf   :  { %p2432_p6 = por %p2431_p5, %p2430_p4 }
  0x11   :  { %p2433_p7 = pnand %p2432_p6, %p2426_p3 }
  0x13   :  { %2436 = shalt.err (!%p2433_p7)
}
  0x14   :  { %s2603_s29 = smov 128   ;;  %s2604_s30 = smov 8  }
  0x15   :  { %44 = dma.hbm_to_vmem [thread:$0]  %s3000_s1, 256, %s39_s18, [#allocation6], %s2603_s29, %s2603_s29, %s2604_s30  }
  0x16   :  { %s2437_s16 = scalar_lea.hbm %s3002_s3, 512 }
  0x17   :  { %p2438_p8 = scmp.ne.s32.totalorder %s3002_s3, %s2437_s16  ;;  %p2441_p9 = scmp.lt.u32.totalorder %s2437_s16, %s3002_s3 }
  0x19   :  { %p2443_p10 = pnand %p2441_p9, %p2438_p8 }
  0x1b   :  { %2446 = shalt.err (!%p2443_p10)
}
  0x1c   :  { %s2447_s23 = scalar_lea.vmem %s2676_s20, 512  ;;  %p2452_p12 = scmp.lt.s32.totalorder %s2676_s20, %s2676_s20 }
  0x1d   :  { %p2448_p11 = scmp.ne.s32.totalorder %s2676_s20, %s2447_s23  ;;  %p2453_p13 = scmp.lt.s32.totalorder %s2447_s23, %s2447_s23 }
  0x1f   :  { %p2454_p0 = por %p2453_p13, %p2452_p12 }
  0x21   :  { %p2455_p1 = pnand %p2454_p0, %p2448_p11 }
  0x23   :  { %2458 = shalt.err (!%p2455_p1)
}
  0x24   :  { %68 = dma.hbm_to_vmem [thread:$0]  %s3002_s3, 512, %s2676_s20, [#allocation9], %s2603_s29, %s2603_s29, %s2604_s30  }
  0x25   :  { %s2605_s24 = smov [#allocation11]   ;;  %s2606_s26 = smov [#allocation2]  }
  0x26   :  { %s90_s25 = sshll.u32 %s2605_s24, 4  ;;  %s26_s27 = sshll.u32 %s2606_s26, 4  ;;  %s91_s25 = int_to_ptr.vmem [resolvable:$true] %s90_s25  ;;  %s2713_s27 = int_to_ptr.vmem [resolvable:$true] %s26_s27 }
  0x27   :  { %s2459_s13 = scalar_lea.hbm %s3006_s7, 512 }
  0x28   :  { %p2460_p2 = scmp.ne.s32.totalorder %s3006_s7, %s2459_s13  ;;  %p2463_p3 = scmp.lt.u32.totalorder %s2459_s13, %s3006_s7 }
  0x2a   :  { %p2465_p4 = pnand %p2463_p3, %p2460_p2 }
  0x2c   :  { %2468 = shalt.err (!%p2465_p4)
}
  0x2d   :  { %s2469_s3 = scalar_lea.vmem %s91_s25, 512  ;;  %p2474_p6 = scmp.lt.s32.totalorder %s91_s25, %s91_s25 }
  0x2e   :  { %p2470_p5 = scmp.ne.s32.totalorder %s91_s25, %s2469_s3  ;;  %p2475_p7 = scmp.lt.s32.totalorder %s2469_s3, %s2469_s3 }
  0x30   :  { %p2476_p8 = por %p2475_p7, %p2474_p6 }
  0x32   :  { %p2477_p9 = pnand %p2476_p8, %p2470_p5 }
  0x34   :  { %2480 = shalt.err (!%p2477_p9)
}
  0x35   :  { %96 = dma.hbm_to_vmem [thread:$0]  %s3006_s7, 512, %s91_s25, [#allocation12], %s2603_s29, %s2603_s29, %s2604_s30  }
  0x36   :  { %s2481_s23 = scalar_lea.hbm %s2999_s0, 256 }
  0x37   :  { %p2482_p10 = scmp.ne.s32.totalorder %s2999_s0, %s2481_s23  ;;  %p2485_p11 = scmp.lt.u32.totalorder %s2481_s23, %s2999_s0 }
  0x39   :  { %p2487_p12 = pnand %p2485_p11, %p2482_p10 }
  0x3b   :  { %2490 = shalt.err (!%p2487_p12)
}
  0x3c   :  { %s2491_s28 = scalar_lea.vmem %s2713_s27, 256  ;;  %p2496_p0 = scmp.lt.s32.totalorder %s2713_s27, %s2713_s27 }
  0x3d   :  { %p2492_p13 = scmp.ne.s32.totalorder %s2713_s27, %s2491_s28  ;;  %p2497_p1 = scmp.lt.s32.totalorder %s2491_s28, %s2491_s28 }
  0x3f   :  { %p2498_p2 = por %p2497_p1, %p2496_p0 }
  0x41   :  { %p2499_p3 = pnand %p2498_p2, %p2492_p13 }
  0x43   :  { %2502 = shalt.err (!%p2499_p3)
}
  0x44   :  { %32 = dma.hbm_to_vmem [thread:$0]  %s2999_s0, 256, %s2713_s27, [#allocation3], %s2603_s29, %s2603_s29, %s2604_s30  }
  0x45   :  { %s2607_s12 = smov [#allocation7]   ;;  %s2608_s14 = smov [#allocation10]  }
  0x46   :  { %s50_s13 = sshll.u32 %s2607_s12, 4  ;;  %s76_s15 = sshll.u32 %s2608_s14, 4  ;;  %s51_s13 = int_to_ptr.vmem [resolvable:$true] %s50_s13  ;;  %s2750_s15 = int_to_ptr.vmem [resolvable:$true] %s76_s15 }
  0x47   :  { %s2503_s3 = scalar_lea.hbm %s3001_s2, 256 }
  0x48   :  { %p2504_p4 = scmp.ne.s32.totalorder %s3001_s2, %s2503_s3  ;;  %p2507_p5 = scmp.lt.u32.totalorder %s2503_s3, %s3001_s2 }
  0x4a   :  { %p2509_p6 = pnand %p2507_p5, %p2504_p4 }
  0x4c   :  { %2512 = shalt.err (!%p2509_p6)
}
  0x4d   :  { %s2513_s0 = scalar_lea.vmem %s51_s13, 256  ;;  %p2518_p8 = scmp.lt.s32.totalorder %s51_s13, %s51_s13 }
  0x4e   :  { %p2514_p7 = scmp.ne.s32.totalorder %s51_s13, %s2513_s0  ;;  %p2519_p9 = scmp.lt.s32.totalorder %s2513_s0, %s2513_s0 }
  0x50   :  { %p2520_p10 = por %p2519_p9, %p2518_p8 }
  0x52   :  { %p2521_p11 = pnand %p2520_p10, %p2514_p7 }
  0x54   :  { %2524 = shalt.err (!%p2521_p11)
}
  0x55   :  { %56 = dma.hbm_to_vmem [thread:$0]  %s3001_s2, 256, %s51_s13, [#allocation6], %s2603_s29, %s2603_s29, %s2604_s30  }
  0x56   :  { %s2525_s24 = scalar_lea.hbm %s3004_s5, 512 }
  0x57   :  { %p2526_p12 = scmp.ne.s32.totalorder %s3004_s5, %s2525_s24  ;;  %p2529_p13 = scmp.lt.u32.totalorder %s2525_s24, %s3004_s5 }
  0x59   :  { %p2531_p0 = pnand %p2529_p13, %p2526_p12 }
  0x5b   :  { %2534 = shalt.err (!%p2531_p0)
}
  0x5c   :  { %s2535_s12 = scalar_lea.vmem %s2750_s15, 512  ;;  %p2540_p2 = scmp.lt.s32.totalorder %s2750_s15, %s2750_s15 }
  0x5d   :  { %p2536_p1 = scmp.ne.s32.totalorder %s2750_s15, %s2535_s12  ;;  %p2541_p3 = scmp.lt.s32.totalorder %s2535_s12, %s2535_s12 }
  0x5f   :  { %p2542_p4 = por %p2541_p3, %p2540_p2 }
  0x61   :  { %p2543_p5 = pnand %p2542_p4, %p2536_p1 }
  0x63   :  { %2546 = shalt.err (!%p2543_p5)
}
  0x64   :  { %82 = dma.hbm_to_vmem [thread:$0]  %s3004_s5, 512, %s2750_s15, [#allocation9], %s2603_s29, %s2603_s29, %s2604_s30  }
  0x65   :  { %s2609_s14 = smov [#allocation13]   ;;  %s2547_s20 = scalar_lea.hbm %s3007_s8, 16 }
  0x66   :  { %s103_s16 = sshll.u32 %s2609_s14, 4  ;;  %p2548_p6 = scmp.ne.s32.totalorder %s3007_s8, %s2547_s20  ;;  %s104_s16 = int_to_ptr.vmem [resolvable:$true] %s103_s16 }
  0x67   :  { %p2551_p7 = scmp.lt.u32.totalorder %s2547_s20, %s3007_s8 }
  0x69   :  { %p2553_p8 = pnand %p2551_p7, %p2548_p6 }
  0x6b   :  { %2556 = shalt.err (!%p2553_p8)
}
  0x6c   :  { %s2557_s27 = scalar_lea.vmem %s104_s16, 16  ;;  %s2561_s5 = scalar_lea.vmem %s104_s16, 32 }
  0x6d   :  { %p2558_p9 = scmp.ne.s32.totalorder %s104_s16, %s2557_s27  ;;  %p2562_p10 = scmp.lt.s32.totalorder %s104_s16, %s104_s16 }
  0x6e   :  { %p2563_p11 = scmp.lt.s32.totalorder %s2561_s5, %s2557_s27 }
  0x70   :  { %p2564_p12 = por %p2563_p11, %p2562_p10 }
  0x72   :  { %p2565_p13 = pnand %p2564_p12, %p2558_p9 }
  0x74   :  { %2568 = shalt.err (!%p2565_p13)
}
  0x75   :  { %106 = dma.hbm_to_vmem [thread:$0]  %s3007_s8, 16, %s104_s16, [#allocation12]  }
  0x76   :  { %2591 = dma.done.wait [#allocation3], 256  }
  0x77   :  { %2592 = vsyncadd [#allocation3], 4294967040 }
  0x78   :  { %2593 = dma.done.wait [#allocation6], 512  }
  0x79   :  { %2594 = vsyncadd [#allocation6], 4294966784 }
  0x7a   :  { %2595 = dma.done.wait [#allocation9], 1024  }
  0x7b   :  { %2596 = vsyncadd [#allocation9], 4294966272 }
  0x7c   :  { %2597 = dma.done.wait [#allocation12], 528  }
  0x7d   :  { %2598 = vsyncadd [#allocation12], 4294966768  ;;  %v134_v0 = vld [vmem:[#allocation8] sm:$0xff]  ;;  %v135_v1 = vld [vmem:[#allocation8 + $0x8] sm:$0xff]  ;;  %vm145_vm0 = vcmask 261120   ;;  %v2610_v16 = vmov 0.0  }
  0x7e   :  { %v229_v2 = vld [vmem:[#allocation10] sm:$0xff]  ;;  %v2338_v3 = vpack.c.bf16 %v135_v1, %v134_v0  ;;  %v230_v4 = vld [vmem:[#allocation10 + $0x8] sm:$0xff]  ;;  %v136_v5 = vld [vmem:[#allocation8 + $0x10] sm:$0xff]  ;;  %vm2611_vm1 = vmmov 0   ;;  %vm421_vm2 = vcmask 64512   ;;  %s2614_s12 = smov 104  }
  0x7f   :  { %v137_v6 = vld [vmem:[#allocation8 + $0x18] sm:$0xff]  ;;  %v2346_v7 = vpack.c.bf16 %v230_v4, %v229_v2  ;;  %v231_v9 = vld [vmem:[#allocation10 + $0x10] sm:$0xff]  ;;  %v227_v13 = vld [vmem:[#allocation5] sm:$0xff]  ;;  %s2615_s3 = smov [#allocation14]  }
  0x80   :  { %v2342_v8 = vpack.c.bf16 %v137_v6, %v136_v5  ;;  %v232_v10 = vld [vmem:[#allocation10 + $0x18] sm:$0xff]  ;;  %v132_v11 = vld [vmem:[#allocation2] sm:$0xff]  ;;  %2339 = vmatprep.subr.bf16.mxu0 %v2338_v3  ;;  %2224 = vmatprep.mubr.msk.f32.mxu1 %vm145_vm0, %v227_v13  ;;  %v228_v15 = vld [vmem:[#allocation5 + $0x8] sm:$0xff]  ;;  %s2086_s20 = sshll.u32 %s2615_s3, 4  ;;  %s2087_s20 = int_to_ptr.vmem [resolvable:$true] %s2086_s20 }
  0x81   :  { %v2350_v12 = vpack.c.bf16 %v232_v10, %v231_v9  ;;  %2213 = vmatprep.mubr.msk.f32.mxu0 %vm145_vm0, %v132_v11  ;;  %2347 = vmatprep.subr.bf16.mxu1 %v2346_v7  ;;  %v133_v14 = vld [vmem:[#allocation2 + $0x8] sm:$0xff]  ;;  %v323_v17 = vld [vmem:[#allocation11] sm:$0xff]  ;;  %v324_v18 = vld [vmem:[#allocation11 + $0x8] sm:$0xff]  ;;  %s2569_s19 = scalar_lea.vmem %s2087_s20, 256  ;;  %p2574_p1 = scmp.lt.s32.totalorder %s2087_s20, %s2087_s20 }
  0x82   :  { %2341 = vmatpush3.bf16.msra.mxu0 %v2338_v3  ;;  %2349 = vmatpush3.bf16.msra.mxu1 %v2346_v7  ;;  %v325_v19 = vld [vmem:[#allocation11 + $0x10] sm:$0xff]  ;;  %v2354_v20 = vpack.c.bf16 %v324_v18, %v323_v17  ;;  %v326_v21 = vld [vmem:[#allocation11 + $0x18] sm:$0xff]  ;;  %v2107_v44 = vld [vmem:[#allocation13] ss:$0 sm:$0xff]  ;;  %p2570_p0 = scmp.ne.s32.totalorder %s2087_s20, %s2569_s19  ;;  %p2575_p2 = scmp.lt.s32.totalorder %s2569_s19, %s2569_s19 }
  0x83   :  { %2343 = vmatprep.subr.bf16.mxu0 %v2342_v8  ;;  %2351 = vmatprep.subr.bf16.mxu1 %v2350_v12  ;;  %v321_v22 = vld [vmem:[#allocation7] sm:$0xff]  ;;  %v2358_v23 = vpack.c.bf16 %v326_v21, %v325_v19  ;;  %v322_v24 = vld [vmem:[#allocation7 + $0x8] sm:$0xff] }
  0x84   :  { %v2101_v25 = vld [vmem:[%s3003_s4] ss:$0 sm:$0xff]  ;;  %s2612_s4 = smov 120   ;;  %p2576_p3 = por %p2575_p2, %p2574_p1 }
  0x85   :  { %v2104_v26 = vld [vmem:[%s3005_s6] ss:$0 sm:$0xff]  ;;  %s2613_s6 = smov 112  }
  0x86   :  { %2345 = vmatpush3.bf16.msra.mxu0 %v2342_v8  ;;  %2353 = vmatpush3.bf16.msra.mxu1 %v2350_v12  ;;  %p2577_p4 = pnand %p2576_p3, %p2570_p0 }
  0x87   :  { %2238 = vmatprep.subr.mxu1 %v2610_v16  ;;  %2355 = vmatprep.subr.bf16.mxu0 %v2354_v20 }
  0x89   :  { %2214 = vmatmul.mubr.msk.f32.vlgmr.msra.gmra.mrb[0].mxu0 %vm145_vm0, %v133_v14  ;;  %2225 = vmatmul.mubr.msk.f32.vlgmr.msra.gmra.mrb[0].mxu1 %vm145_vm0, %v228_v15 }
  0x8a   :  { %2240 = vmatprep.mubr.msk.f32.mxu1 %vm2611_vm1, %v2610_v16  ;;  %2235 = vmatprep.mubr.msk.f32.mxu0 %vm145_vm0, %v321_v22 }
  0x8b   :  { %2357 = vmatpush3.bf16.msra.mxu0 %v2354_v20 }
  0x8c   :  { %2359 = vmatprep.subr.bf16.mxu0 %v2358_v23 }
  0x8f   :  { %2361 = vmatpush3.bf16.msra.mxu0 %v2358_v23 }
  0x90   :  { %2258 = vmatprep.subr.mxu0 %v2610_v16 }
  0x92   :  { %2236 = vmatmul.mubr.msk.f32.vlgmr.msra.gmra.mrb[2].mxu0 %vm145_vm0, %v322_v24 }
  0x93   :  { %2260 = vmatprep.mubr.msk.f32.mxu0 %vm2611_vm1, %v2610_v16 }
 0x15c   :  { %v2215_v27 = vpop.f32.mrb[0].mxu0  ;;  %v2226_v29 = vpop.f32.mrb[0].mxu1 }
 0x15d   :  { %v224_v28 = vadd.f32 %v2215_v27, %v2101_v25  ;;  %v218_v30 = vpop.f32.mrb[1].mxu0  ;;  %v2817_v31 = vadd.f32 %v2226_v29, %v2104_v26  ;;  %v312_v33 = vpop.f32.mrb[1].mxu1 }
 0x15e   :  { %v219_v32 = vadd.f32 %v2101_v25, %v218_v30  ;;  %v2819_v34 = vadd.f32 %v2104_v26, %v312_v33  ;;  %v418_v25 = vld [vmem:[%s3008_s9 + $0x8] sm:$0xff]  ;;  %v417_v26 = vld [vmem:[%s3008_s9] sm:$0xff] }
 0x15f   :  { %v2821_v35 = vmul.f32 0.35355338, %v224_v28  ;;  %824 = vrot.lane.b32.xlu1 %v2817_v31, %s2612_s4 }
 0x160   :  { %v2823_v36 = vmul.f32 0.35355338, %v219_v32  ;;  %2239 = vmatpush3.xpose.msk.msra.mxu1 %vm421_vm2, %v2819_v34 }
 0x161   :  { %2243 = vmatprep.subr.mxu1 %v2610_v16 }
 0x163   :  { %822 = vrot.lane.b32.xlu1 %v2821_v35, %s2612_s4  ;;  %2241 = vmatmul.mubr.msk.f32.vlgmr.msra.gmra.mrb[2].mxu1 %vm421_vm2, %v2823_v36 }
 0x164   :  { %2244 = vmatpush3.xpose.msk.msra.mxu1 %vm421_vm2, %v2817_v31  ;;  %2245 = vmatprep.mubr.msk.f32.mxu1 %vm2611_vm1, %v2610_v16 }
 0x165   :  { %2248 = vmatprep.subr.mxu1 %v2610_v16  ;;  %v2237_v37 = vpop.f32.mrb[2].mxu0 }
 0x166   :  { %v406_v45 = vpop.f32.mrb[3].mxu0  ;;  %v2852_v47 = vadd.f32 %v2237_v37, %v2107_v44 }
 0x167   :  { %744 = vrot.lane.b32.xlu1 %v2823_v36, %s2612_s4  ;;  %2246 = vmatmul.mubr.msk.f32.vlgmr.msra.gmra.mrb[4].mxu1 %vm421_vm2, %v2821_v35  ;;  %v2847_v46 = vadd.f32 %v2107_v44, %v406_v45 }
 0x168   :  { %2250 = vmatprep.mubr.msk.f32.mxu1 %vm2611_vm1, %v2610_v16 }
 0x169   :  { %2249 = vmatpush3.msra.mxu1 %v2847_v46 }
 0x16a   :  { %2253 = vmatprep.subr.mxu1 %v2610_v16 }
 0x1d1   :  { %v825_v48 = vpop.permute.xlu1 %824 }
 0x1d5   :  { %v823_v53 = vpop.permute.xlu1 %822 }
 0x1d9   :  { %v745_v57 = vpop.permute.xlu1 %744 }
 0x236   :  { %v494_v38 = vpop.f32.mrb[2].mxu1 }
 0x237   :  { %v2242_v39 = vpop.f32.mrb[3].mxu1  ;;  %v574_v40 = vsel %vm421_vm2, %v494_v38, -inf }
 0x238   :  { %575 = vmax.xlane.f32.xlu0 %v574_v40 }
 0x23a   :  { %v570_v41 = vpop.f32.mrb[4].mxu1 }
 0x23b   :  { %v2247_v42 = vpop.f32.mrb[5].mxu1  ;;  %v577_v43 = vsel %vm421_vm2, %v570_v41, -inf }
 0x23c   :  { %578 = vmax.xlane.f32.xlu0 %v577_v43 }
 0x252   :  { %746 = vrot.lane.b32.xlu0 %v2819_v34, %s2612_s4 }
 0x256   :  { %996 = vrot.lane.b32.xlu0 %v2852_v47, %s2612_s4 }
 0x25a   :  { %1242 = vrot.lane.b32.xlu0 %v2819_v34, %s2613_s6 }
 0x25e   :  { %1240 = vrot.lane.b32.xlu0 %v2823_v36, %s2613_s6 }
 0x262   :  { %1320 = vrot.lane.b32.xlu0 %v2817_v31, %s2613_s6 }
 0x266   :  { %1318 = vrot.lane.b32.xlu0 %v2821_v35, %s2613_s6 }
 0x26a   :  { %919 = vrot.lane.b32.xlu0 %v2847_v46, %s2612_s4 }
 0x2c5   :  { %v576_v49 = vpop.xlane.xlu0 %575 }
 0x2c6   :  { %v580_v50 = vsub.f32 %v494_v38, %v576_v49 }
 0x2c8   :  { %v582_v51 = vmul.f32 1.442695, %v580_v50 }
 0x2c9   :  { %v579_v52 = vpop.xlane.xlu0 %578 }
 0x2ca   :  { %2383 = vpow2.f32 %v582_v51  ;;  %v581_v54 = vsub.f32 %v570_v41, %v579_v52 }
 0x2cc   :  { %v584_v55 = vmul.f32 1.442695, %v581_v54 }
 0x2cd   :  { %v747_v56 = vpop.permute.xlu0 %746 }
 0x2ce   :  { %2385 = vpow2.f32 %v584_v55  ;;  %2259 = vmatpush3.xpose.msk.msra.mxu0 %vm421_vm2, %v747_v56 }
 0x2cf   :  { %2268 = vmatprep.subr.mxu0 %v2610_v16 }
 0x2d1   :  { %2261 = vmatmul.mubr.msk.f32.vlgmr.msra.gmra.mrb[4].mxu0 %vm421_vm2, %v745_v57  ;;  %v997_v58 = vpop.permute.xlu0 %996 }
 0x2d2   :  { %2270 = vmatprep.mubr.msk.f32.mxu0 %vm2611_vm1, %v2610_v16 }
 0x2d4   :  { %v2384_v59 = vpop.eup %2383 }
 0x2d5   :  { %2251 = vmatmul.mubr.msk.f32.vlgmr.msra.gmra.mrb[6].mxu1 %vm421_vm2, %v2384_v59  ;;  %v1243_v60 = vpop.permute.xlu0 %1242  ;;  %v586_v23 = vsel %vm421_vm2, %v2384_v59, 0.0 }
 0x2d6   :  { %2254 = vmatpush3.msra.mxu1 %v2852_v47  ;;  %2255 = vmatprep.mubr.msk.f32.mxu1 %vm2611_vm1, %v2610_v16 }
 0x2d7   :  { %2263 = vmatprep.subr.mxu1 %v2610_v16 }
 0x2d8   :  { %v2386_v61 = vpop.eup %2385 }
 0x2d9   :  { %2256 = vmatmul.mubr.msk.f32.vlgmr.msra.gmra.mrb[8].mxu1 %vm421_vm2, %v2386_v61  ;;  %v1241_v62 = vpop.permute.xlu0 %1240  ;;  %v589_v24 = vsel %vm421_vm2, %v2386_v61, 0.0 }
 0x2da   :  { %2265 = vmatprep.mubr.msk.f32.mxu1 %vm2611_vm1, %v2610_v16 }
 0x2dd   :  { %2264 = vmatpush3.xpose.msk.msra.mxu1 %vm421_vm2, %v825_v48  ;;  %v1321_v63 = vpop.permute.xlu0 %1320 }
 0x2de   :  { %2273 = vmatprep.subr.mxu1 %v2610_v16 }
 0x2e0   :  { %2266 = vmatmul.mubr.msk.f32.vlgmr.msra.gmra.mrb[10].mxu1 %vm421_vm2, %v823_v53 }
 0x2e1   :  { %v1319_v0 = vpop.permute.xlu0 %1318  ;;  %2274 = vmatpush3.msra.mxu1 %v997_v58  ;;  %2275 = vmatprep.mubr.msk.f32.mxu1 %vm2611_vm1, %v2610_v16 }
 0x2e2   :  { %2288 = vmatprep.subr.mxu1 %v2610_v16 }
 0x2e5   :  { %v920_v1 = vpop.permute.xlu0 %919 }
 0x2e6   :  { %2269 = vmatpush3.msra.mxu0 %v920_v1 }
 0x2e7   :  { %2278 = vmatprep.subr.mxu0 %v418_v25 }
 0x3a4   :  { %v818_v2 = vpop.f32.mrb[4].mxu0 }
 0x3a5   :  { %v2262_v3 = vpop.f32.mrb[5].mxu0  ;;  %v900_v11 = vsel %vm421_vm2, %v818_v2, -inf }
 0x3a6   :  { %v419_v3 = vld [vmem:[%s3008_s9 + $0x10] sm:$0xff] }
 0x3a8   :  { %v2886_v4 = vpop.f32.mrb[6].mxu1 }
 0x3a9   :  { %v2252_v5 = vpop.f32.mrb[7].mxu1 }
 0x3ac   :  { %v2888_v6 = vpop.f32.mrb[8].mxu1 }
 0x3ad   :  { %v2257_v7 = vpop.f32.mrb[9].mxu1 }
 0x3b3   :  { %v896_v8 = vpop.f32.mrb[10].mxu1 }
 0x3b4   :  { %v2267_v9 = vpop.f32.mrb[11].mxu1  ;;  %v903_v10 = vsel %vm421_vm2, %v896_v8, -inf }
 0x3b5   :  { %904 = vmax.xlane.f32.xlu1 %v903_v10 }
 0x3b9   :  { %901 = vmax.xlane.f32.xlu1 %v900_v11 }
 0x442   :  { %v905_v12 = vpop.xlane.xlu1 %904 }
 0x443   :  { %v907_v13 = vsub.f32 %v896_v8, %v905_v12 }
 0x445   :  { %v910_v14 = vmul.f32 1.442695, %v907_v13 }
 0x446   :  { %v902_v15 = vpop.xlane.xlu1 %901 }
 0x447   :  { %2387 = vpow2.f32 %v910_v14  ;;  %v906_v17 = vsub.f32 %v818_v2, %v902_v15 }
 0x449   :  { %v908_v18 = vmul.f32 1.442695, %v906_v17 }
 0x44b   :  { %2389 = vpow2.f32 %v908_v18 }
 0x451   :  { %v2388_v19 = vpop.eup %2387 }
 0x452   :  { %2276 = vmatmul.mubr.msk.f32.vlgmr.msra.gmra.mrb[12].mxu1 %vm421_vm2, %v2388_v19  ;;  %v915_v20 = vsel %vm421_vm2, %v2388_v19, 0.0 }
 0x453   :  { %2289 = vmatpush3.xpose.msk.msra.mxu1 %vm421_vm2, %v1243_v60  ;;  %916 = vadd.xlane.f32.xlu0 %v915_v20 }
 0x454   :  { %2290 = vmatprep.mubr.msk.f32.mxu1 %vm2611_vm1, %v2610_v16  ;;  %2293 = vmatprep.subr.mxu1 %v2610_v16 }
 0x455   :  { %v2390_v21 = vpop.eup %2389 }
 0x456   :  { %2271 = vmatmul.mubr.msk.f32.vlgmr.msra.gmra.mrb[6].mxu0 %vm421_vm2, %v2390_v21  ;;  %2291 = vmatmul.mubr.msk.f32.vlgmr.msra.gmra.mrb[14].mxu1 %vm421_vm2, %v1241_v62  ;;  %v912_v22 = vsel %vm421_vm2, %v2390_v21, 0.0 }
 0x457   :  { %2294 = vmatpush3.xpose.msk.msra.mxu1 %vm421_vm2, %v1321_v63  ;;  %913 = vadd.xlane.f32.xlu1 %v912_v22 }
 0x458   :  { %2295 = vmatprep.mubr.msk.f32.mxu1 %vm2611_vm1, %v2610_v16  ;;  %2303 = vmatprep.subr.mxu1 %v2610_v16 }
 0x459   :  { %2279 = vmatpush3.msra.mxu0 %v418_v25 }
 0x45a   :  { %2296 = vmatmul.mubr.msk.f32.vlgmr.msra.gmra.mrb[16].mxu1 %vm421_vm2, %v1319_v0  ;;  %2283 = vmatprep.subr.mxu0 %v417_v26 }
 0x45b   :  { %587 = vadd.xlane.f32.xlu1 %v586_v23  ;;  %2305 = vmatprep.mubr.msk.f32.mxu1 %vm2611_vm1, %v2610_v16 }
 0x45f   :  { %590 = vadd.xlane.f32.xlu1 %v589_v24 }
 0x469   :  { %1490 = vrot.lane.b32.xlu0 %v2852_v47, %s2613_s6 }
 0x4e0   :  { %v917_v27 = vpop.xlane.xlu0 %916 }
 0x4e4   :  { %v1491_v28 = vpop.permute.xlu0 %1490  ;;  %v914_v29 = vpop.xlane.xlu1 %913 }
 0x4e5   :  { %2304 = vmatpush3.msra.mxu1 %v1491_v28  ;;  %2391 = vrcp.f32 %v914_v29 }
 0x4e6   :  { %2313 = vmatprep.subr.mxu1 %v2610_v16 }
 0x4e8   :  { %v588_v30 = vpop.xlane.xlu1 %587 }
 0x4e9   :  { %2393 = vrcp.f32 %v588_v30  ;;  %v420_v30 = vld [vmem:[%s3008_s9 + $0x18] sm:$0xff] }
 0x4ea   :  { %2395 = vrcp.f32 %v917_v27 }
 0x4ec   :  { %v591_v32 = vpop.xlane.xlu1 %590 }
 0x4ed   :  { %2397 = vrcp.f32 %v591_v32 }
 0x4ef   :  { %v2392_v38 = vpop.eup %2391 }
 0x4f3   :  { %v2394_v39 = vpop.eup %2393 }
 0x4f4   :  { %v2396_v42 = vpop.eup %2395  ;;  %v742_v50 = vmul.f32 %v2394_v39, %v2886_v4 }
 0x4f7   :  { %v2398_v54 = vpop.eup %2397 }
 0x4f8   :  { %v743_v55 = vmul.f32 %v2398_v54, %v2888_v6 }
 0x525   :  { %v1068_v33 = vpop.f32.mrb[12].mxu1 }
 0x526   :  { %v2277_v37 = vpop.f32.mrb[13].mxu1  ;;  %v1077_v49 = vmul.f32 %v2396_v42, %v1068_v33 }
 0x529   :  { %v991_v40 = vpop.f32.mrb[6].mxu0  ;;  %v1314_v41 = vpop.f32.mrb[14].mxu1 }
 0x52a   :  { %v1076_v43 = vmul.f32 %v2392_v38, %v991_v40  ;;  %v2272_v44 = vpop.f32.mrb[7].mxu0  ;;  %v2292_v45 = vpop.f32.mrb[15].mxu1  ;;  %v1396_v48 = vsel %vm421_vm2, %v1314_v41, -inf }
 0x52b   :  { %1397 = vmax.xlane.f32.xlu1 %v1396_v48  ;;  %v2142_v45 = vld [vmem:[%s3009_s10] ss:$0 sm:$0xff] }
 0x52c   :  { %2280 = vmatprep.mubr.msk.f32.mxu0 %vm421_vm2, %v1076_v43 }
 0x52d   :  { %2281 = vmatmul.mubr.msk.f32.vlgmr.msra.gmra.mrb[8].mxu0 %vm421_vm2, %v1077_v49  ;;  %v1392_v51 = vpop.f32.mrb[16].mxu1 }
 0x52e   :  { %2285 = vmatprep.mubr.msk.f32.mxu0 %vm421_vm2, %v742_v50  ;;  %v2297_v52 = vpop.f32.mrb[17].mxu1  ;;  %v1399_v53 = vsel %vm421_vm2, %v1392_v51, -inf  ;;  %2284 = vmatpush3.msra.mxu0 %v417_v26 }
 0x52f   :  { %1400 = vmax.xlane.f32.xlu1 %v1399_v53  ;;  %2298 = vmatprep.subr.mxu0 %v2610_v16 }
 0x535   :  { %2286 = vmatmul.mubr.msk.f32.vlgmr.msra.gmra.mrb[8].mxu0 %vm421_vm2, %v743_v55 }
 0x536   :  { %2300 = vmatprep.mubr.msk.f32.mxu0 %vm2611_vm1, %v2610_v16 }
 0x540   :  { %1414 = vrot.lane.b32.xlu1 %v2847_v46, %s2613_s6 }
 0x544   :  { %1657 = vrot.lane.b32.xlu1 %v2819_v34, %s2614_s12 }
 0x5b8   :  { %v1398_v56 = vpop.xlane.xlu1 %1397 }
 0x5b9   :  { %v1402_v57 = vsub.f32 %v1314_v41, %v1398_v56 }
 0x5bb   :  { %v1404_v58 = vmul.f32 1.442695, %v1402_v57 }
 0x5bc   :  { %v1401_v59 = vpop.xlane.xlu1 %1400 }
 0x5bd   :  { %2399 = vpow2.f32 %v1404_v58  ;;  %v1403_v60 = vsub.f32 %v1392_v51, %v1401_v59 }
 0x5bf   :  { %v1406_v61 = vmul.f32 1.442695, %v1403_v60 }
 0x5c0   :  { %v1415_v62 = vpop.permute.xlu1 %1414 }
 0x5c1   :  { %2401 = vpow2.f32 %v1406_v61  ;;  %2299 = vmatpush3.msra.mxu0 %v1415_v62 }
 0x5c2   :  { %2308 = vmatprep.subr.mxu0 %v419_v3 }
 0x5c4   :  { %v1658_v2 = vpop.permute.xlu1 %1657 }
 0x5c7   :  { %v2400_v63 = vpop.eup %2399 }
 0x5c8   :  { %2301 = vmatmul.mubr.msk.f32.vlgmr.msra.gmra.mrb[10].mxu0 %vm421_vm2, %v2400_v63  ;;  %v1408_v0 = vsel %vm421_vm2, %v2400_v63, 0.0 }
 0x5c9   :  { %1409 = vadd.xlane.f32.xlu1 %v1408_v0  ;;  %2309 = vmatpush3.msra.mxu0 %v419_v3 }
 0x5ca   :  { %2318 = vmatprep.subr.mxu0 %v2610_v16 }
 0x5cb   :  { %v2402_v1 = vpop.eup %2401 }
 0x5cc   :  { %2306 = vmatmul.mubr.msk.f32.vlgmr.msra.gmra.mrb[18].mxu1 %vm421_vm2, %v2402_v1  ;;  %v1411_v34 = vsel %vm421_vm2, %v2402_v1, 0.0 }
 0x5cd   :  { %2314 = vmatpush3.xpose.msk.msra.mxu1 %vm421_vm2, %v1658_v2  ;;  %1412 = vadd.xlane.f32.xlu0 %v1411_v34 }
 0x5ce   :  { %2315 = vmatprep.mubr.msk.f32.mxu1 %vm2611_vm1, %v2610_v16  ;;  %2323 = vmatprep.subr.mxu1 %v2610_v16 }
 0x5da   :  { %1655 = vrot.lane.b32.xlu1 %v2823_v36, %s2614_s12 }
 0x5de   :  { %1733 = vrot.lane.b32.xlu1 %v2821_v35, %s2614_s12 }
 0x5e3   :  { %1735 = vrot.lane.b32.xlu0 %v2817_v31, %s2614_s12 }
 0x656   :  { %v1410_v4 = vpop.xlane.xlu1 %1409 }
 0x657   :  { %2403 = vrcp.f32 %v1410_v4 }
 0x65a   :  { %v1656_v5 = vpop.permute.xlu1 %1655  ;;  %v1413_v35 = vpop.xlane.xlu0 %1412 }
 0x65b   :  { %2316 = vmatmul.mubr.msk.f32.vlgmr.msra.gmra.mrb[20].mxu1 %vm421_vm2, %v1656_v5  ;;  %2405 = vrcp.f32 %v1413_v35 }
 0x65c   :  { %2325 = vmatprep.mubr.msk.f32.mxu1 %vm2611_vm1, %v2610_v16 }
 0x65e   :  { %v1736_v12 = vpop.permute.xlu0 %1735  ;;  %v1734_v13 = vpop.permute.xlu1 %1733 }
 0x661   :  { %v2404_v36 = vpop.eup %2403 }
 0x665   :  { %v2406_v9 = vpop.eup %2405 }
 0x69b   :  { %v1486_v6 = vpop.f32.mrb[10].mxu0 }
 0x69c   :  { %v1570_v7 = vmul.f32 %v2404_v36, %v1486_v6  ;;  %v2302_v8 = vpop.f32.mrb[11].mxu0 }
 0x69e   :  { %2310 = vmatprep.mubr.msk.f32.mxu0 %vm421_vm2, %v1570_v7 }
 0x69f   :  { %v1562_v10 = vpop.f32.mrb[18].mxu1 }
 0x6a0   :  { %v1571_v11 = vmul.f32 %v2406_v9, %v1562_v10  ;;  %v2307_v31 = vpop.f32.mrb[19].mxu1 }
 0x6a2   :  { %2311 = vmatmul.mubr.msk.f32.vlgmr.msra.gmra.mrb[8].mxu0 %vm421_vm2, %v1571_v11 }
 0x6a3   :  { %2319 = vmatpush3.xpose.msk.msra.mxu0 %vm421_vm2, %v1736_v12  ;;  %2320 = vmatprep.mubr.msk.f32.mxu0 %vm2611_vm1, %v2610_v16 }
 0x6a4   :  { %2328 = vmatprep.subr.mxu0 %v2610_v16 }
 0x6a6   :  { %2321 = vmatmul.mubr.msk.f32.vlgmr.msra.gmra.mrb[12].mxu0 %vm421_vm2, %v1734_v13 }
 0x6a7   :  { %2330 = vmatprep.mubr.msk.f32.mxu0 %vm2611_vm1, %v2610_v16 }
 0x72e   :  { %v1729_v14 = vpop.f32.mrb[20].mxu1 }
 0x72f   :  { %v2317_v15 = vpop.f32.mrb[21].mxu1  ;;  %v1811_v17 = vsel %vm421_vm2, %v1729_v14, -inf }
 0x730   :  { %1812 = vmax.xlane.f32.xlu1 %v1811_v17 }
 0x741   :  { %1829 = vrot.lane.b32.xlu1 %v2847_v46, %s2614_s12 }
 0x779   :  { %v1807_v18 = vpop.f32.mrb[12].mxu0 }
 0x77a   :  { %v2322_v19 = vpop.f32.mrb[13].mxu0  ;;  %v1814_v20 = vsel %vm421_vm2, %v1807_v18, -inf }
 0x77b   :  { %1815 = vmax.xlane.f32.xlu0 %v1814_v20 }
 0x791   :  { %1905 = vrot.lane.b32.xlu0 %v2852_v47, %s2614_s12 }
 0x7bd   :  { %v1813_v21 = vpop.xlane.xlu1 %1812 }
 0x7be   :  { %v1817_v22 = vsub.f32 %v1729_v14, %v1813_v21 }
 0x7c0   :  { %v1819_v23 = vmul.f32 1.442695, %v1817_v22 }
 0x7c1   :  { %v1830_v16 = vpop.permute.xlu1 %1829 }
 0x7c2   :  { %2407 = vpow2.f32 %v1819_v23  ;;  %2324 = vmatpush3.msra.mxu1 %v1830_v16 }
 0x7cc   :  { %v2408_v24 = vpop.eup %2407 }
 0x7cd   :  { %2326 = vmatmul.mubr.msk.f32.vlgmr.msra.gmra.mrb[22].mxu1 %vm421_vm2, %v2408_v24  ;;  %v1823_v25 = vsel %vm421_vm2, %v2408_v24, 0.0 }
 0x7ce   :  { %1824 = vadd.xlane.f32.xlu1 %v1823_v25 }
 0x808   :  { %v1816_v46 = vpop.xlane.xlu0 %1815 }
 0x809   :  { %v1818_v26 = vsub.f32 %v1807_v18, %v1816_v46 }
 0x80b   :  { %v1821_v27 = vmul.f32 1.442695, %v1818_v26 }
 0x80c   :  { %v1906_v28 = vpop.permute.xlu0 %1905 }
 0x80d   :  { %2409 = vpow2.f32 %v1821_v27  ;;  %2329 = vmatpush3.msra.mxu0 %v1906_v28 }
 0x80e   :  { %2333 = vmatprep.subr.mxu0 %v420_v30 }
 0x817   :  { %v2410_v29 = vpop.eup %2409 }
 0x818   :  { %2331 = vmatmul.mubr.msk.f32.vlgmr.msra.gmra.mrb[14].mxu0 %vm421_vm2, %v2410_v29  ;;  %v1826_v47 = vsel %vm421_vm2, %v2410_v29, 0.0 }
 0x819   :  { %1827 = vadd.xlane.f32.xlu0 %v1826_v47  ;;  %2334 = vmatpush3.msra.mxu0 %v420_v30 }
 0x85b   :  { %v1825_v32 = vpop.xlane.xlu1 %1824 }
 0x85c   :  { %2411 = vrcp.f32 %v1825_v32 }
 0x866   :  { %v2412_v33 = vpop.eup %2411 }
 0x8a0   :  { %v1901_v37 = vpop.f32.mrb[22].mxu1 }
 0x8a1   :  { %v1985_v38 = vmul.f32 %v2412_v33, %v1901_v37  ;;  %v2327_v39 = vpop.f32.mrb[23].mxu1 }
 0x8a3   :  { %2335 = vmatprep.mubr.msk.f32.mxu0 %vm421_vm2, %v1985_v38 }
 0x8a6   :  { %v1828_v40 = vpop.xlane.xlu0 %1827 }
 0x8a7   :  { %2413 = vrcp.f32 %v1828_v40 }
 0x8b1   :  { %v2414_v41 = vpop.eup %2413 }
 0x8eb   :  { %v1977_v42 = vpop.f32.mrb[14].mxu0 }
 0x8ec   :  { %v1986_v43 = vmul.f32 %v2414_v41, %v1977_v42  ;;  %v2332_v44 = vpop.f32.mrb[15].mxu0 }
 0x8ee   :  { %2336 = vmatmul.mubr.msk.f32.vlgmr.msra.gmra.mrb[8].mxu0 %vm421_vm2, %v1986_v43 }
 0x9c1   :  { %v2337_v48 = vpop.f32.mrb[8].mxu0 }
 0x9c2   :  { %v2078_v49 = vadd.f32 %v2337_v48, %v2142_v45  ;;  %v2059_v50 = vpop.f32.mrb[9].mxu0 }
 0x9c3   :  { %v2077_v51 = vadd.f32 %v2142_v45, %v2059_v50 }
 0x9c4   :  { %2080 = vst.msk [vmem:[#allocation14 + $0x8] sm:$0xff] %vm145_vm0, %v2078_v49 }
 0x9c5   :  { %2079 = vst.msk [vmem:[#allocation14] sm:$0xff] %vm145_vm0, %v2077_v51 }
 0x9c6   :  { %2580 = shalt.err (!%p2577_p4)
}
 0x9c7   :  { %s2581_s22 = scalar_lea.hbm %s3010_s11, 256 }
 0x9c8   :  { %p2582_p5 = scmp.ne.s32.totalorder %s3010_s11, %s2581_s22  ;;  %p2585_p6 = scmp.lt.u32.totalorder %s2581_s22, %s3010_s11 }
 0x9ca   :  { %p2587_p7 = pnand %p2585_p6, %p2582_p5 }
 0x9cc   :  { %2590 = shalt.err (!%p2587_p7)
}
 0x9cd   :  { %2092 = dma.vmem_to_hbm [thread:$0]  %s2087_s20, 256, %s3010_s11, [#allocation4], %s2603_s29, %s2603_s29, %s2604_s30  }
 0x9ce   :  { %2599 = dma.done.wait [#allocation4], 256  }
 0x9cf   :  { %2600 = vsyncadd [#allocation4], 4294967040 }
 0x9d0   :  { %2096 = vsyncpa [#allocation3], 1 }
 0x9d1   :  { %2097 = vsyncpa [#allocation6], 1 }
 0x9d2   :  { %2098 = vsyncpa [#allocation9], 1 }
 0x9d3   :  { %2099 = vsyncpa [#allocation12], 1 }
 0x9d4   :  { %2100 = vsyncpa [#allocation4], 1 }

</bundles_post_ra>
